<compile_context>
chip_gen: v6e
topology: v6e:2x2x1
jax: 0.10.0
libtpu: 0.0.40
codegen_flags: <defaults>
</compile_context>

<pallas_src>
import functools

import jax
import jax.numpy as jnp
from jax.experimental import pallas as pl
from jax.experimental.pallas import tpu as pltpu

LANES = 128
NEG_BIG = -9e15                     # matches the PyTorch -9e15 masking constant
WH_RESIDENT_BYTES_CAP = 16 << 20    # keep Wh VMEM-resident below this size


# ---------------------------------------------------------------------------
# Kernel 1: projection.  Wh = h @ W_pad ; f1/f2 = per-row dots with a1/a2.
# ---------------------------------------------------------------------------
def proj_kernel(h_ref, w_ref, a_ref, wh_ref, f_ref):
    # h @ W stays in f32: tiny fraction of total flops and it feeds the
    # exponentials; bf16 is reserved for the big attention aggregation matmul.
    wh = jnp.dot(h_ref[...], w_ref[...], preferred_element_type=jnp.float32)
    # Attention projections as VPU multiply + lane reduction instead of
    # 1-wide MXU matmuls (padded columns of W / a are zero, so they are inert).
    f1 = jnp.sum(wh * a_ref[0:1, :], axis=-1, keepdims=True)   # (tm, 1)
    f2 = jnp.sum(wh * a_ref[1:2, :], axis=-1, keepdims=True)   # (tm, 1)
    # Lane-dense (tm, 128) store: lanes 0/1 hold f1/f2, remaining lanes zero.
    pad = jnp.zeros((f1.shape[0], LANES - 2), jnp.float32)
    f_ref[...] = jnp.concatenate([f1, f2, pad], axis=1)
    wh_ref[...] = wh.astype(wh_ref.dtype)                      # bf16 for reuse


# ---------------------------------------------------------------------------
# Kernel 2: flash-style masked attention with online softmax.
# ---------------------------------------------------------------------------
def attn_kernel(f1_ref, f2_ref, adj_ref, wh_ref, out_ref,
                m_ref, l_ref, acc_ref, *, slope, tk, wh_resident):
    kb = pl.program_id(1)

    @pl.when(kb == 0)
    def _():
        m_ref[...] = jnp.full_like(m_ref, -jnp.inf)
        l_ref[...] = jnp.zeros_like(l_ref)
        acc_ref[...] = jnp.zeros_like(acc_ref)

    if wh_resident:
        # Whole Wh array lives in VMEM; slice the current key-block rows.
        start = pl.multiple_of(kb * tk, 128)
        wh_blk = wh_ref[pl.ds(start, tk), :]          # (tk, f_pad) bf16
    else:
        wh_blk = wh_ref[...]                          # streamed (tk, f_pad) block

    # e[i, j] = LeakyReLU(f1[i] + f2[j]); adjacency mask.  All f32 on the VPU.
    e = f1_ref[...] + f2_ref[...]                     # (tq, tk)
    e = jnp.maximum(e, slope * e)                     # LeakyReLU, 0 < slope < 1
    e = jnp.where(adj_ref[...] != 0, e, jnp.float32(NEG_BIG))

    # Online softmax update (max/sum reductions go to the XLU, exp to the EUP).
    m_prev = m_ref[...]
    m_new = jnp.maximum(m_prev, jnp.max(e, axis=1, keepdims=True))
    alpha = jnp.exp(m_prev - m_new)
    p = jnp.exp(e - m_new)                            # (tq, tk) f32
    l_ref[...] = alpha * l_ref[...] + jnp.sum(p, axis=1, keepdims=True)
    acc_ref[...] = alpha * acc_ref[...] + jnp.dot(
        p.astype(wh_blk.dtype), wh_blk,               # bf16 MXU operands
        preferred_element_type=jnp.float32)           # f32 accumulation
    m_ref[...] = m_new

    @pl.when(kb == pl.num_programs(1) - 1)
    def _():
        out_ref[...] = acc_ref[...] * pl.reciprocal(l_ref[...], approx=True)


# ---------------------------------------------------------------------------
# Wrapper
# ---------------------------------------------------------------------------
def _pad_up(x, m):
    return ((x + m - 1) // m) * m


def _pick_tile(n, cap, align):
    """Largest divisor of n that is <= cap and a multiple of `align`.

    n is always a multiple of 128 here (node axis is padded), so an aligned
    divisor always exists for align in {32, 128}."""
    cap = max(align, min(cap, n))
    t = (cap // align) * align
    while t >= align:
        if n % t == 0:
            return t
        t -= align
    return align


def sgat_forward(h, adj, W, a, leakyrelu_slope=0.01,
                 tq_cap=256, tk_cap=1024, tm_cap=512):
    N, f_in = h.shape
    f_out = W.shape[1]
    f_pad = _pad_up(max(f_out, LANES), LANES)

    # Pad the node axis to a multiple of 128.  Padded rows have zero features
    # and zero adjacency: they are masked to -9e15 for every real query row and
    # their Wh rows are zero, so they contribute exactly nothing.  (Rows with
    # no real neighbours degrade to a uniform softmax, matching the PyTorch
    # -9e15 reference behaviour.)
    NP = _pad_up(N, LANES)

    h_p = jnp.zeros((NP, f_in), jnp.float32).at[:N, :].set(h.astype(jnp.float32))
    # Adjacency as int8 mask: 4x smaller HBM/VMEM stream than f32.
    adj_i8 = jnp.zeros((NP, NP), jnp.int8).at[:N, :N].set(
        (adj > 0).astype(jnp.int8))

    # Pad W and a along the output-feature axis (zeros -> inert).
    w_pad = jnp.zeros((f_in, f_pad), jnp.float32).at[:, :f_out].set(
        W.astype(jnp.float32))
    a12 = jnp.zeros((2, f_pad), jnp.float32)
    a12 = a12.at[0, :f_out].set(a[:f_out, 0].astype(jnp.float32))
    a12 = a12.at[1, :f_out].set(a[f_out:, 0].astype(jnp.float32))

    tm = _pick_tile(NP, tm_cap, LANES)
    # tq: 32-aligned (int8 adj packs (32,128)); capped at NP//2 so the
    # "parallel" query axis has >= 2 blocks (both v7x TensorCores stay busy).
    tq = _pick_tile(NP, min(tq_cap, max(32, (NP // 2) // 32 * 32)), 32)
    tk = _pick_tile(NP, tk_cap, LANES)

    # ---- kernel 1: Wh and attention projections ---------------------------
    wh, f12 = pl.pallas_call(
        proj_kernel,
        out_shape=(jax.ShapeDtypeStruct((NP, f_pad), jnp.bfloat16),
                   jax.ShapeDtypeStruct((NP, LANES), jnp.float32)),
        grid_spec=pltpu.PrefetchScalarGridSpec(
            num_scalar_prefetch=0,
            grid=(NP // tm,),
            in_specs=[pl.BlockSpec((tm, f_in), lambda i: (i, 0)),
                      pl.BlockSpec((f_in, f_pad), lambda i: (0, 0)),
                      pl.BlockSpec((2, f_pad), lambda i: (0, 0))],
            out_specs=[pl.BlockSpec((tm, f_pad), lambda i: (i, 0)),
                       pl.BlockSpec((tm, LANES), lambda i: (i, 0))]),
        compiler_params=pltpu.CompilerParams(
            dimension_semantics=("parallel",)),
    )(h_p, w_pad, a12)

    f1 = f12[:, 0:1]                     # (NP, 1)
    f2 = f12[:, 1:2].reshape(1, NP)      # (1, NP): tiny transpose outside kernel

    # Keep Wh resident in VMEM (read from HBM exactly once) when it fits;
    # otherwise fall back to streaming (tk, f_pad) blocks per key step.
    wh_resident = NP * f_pad * 2 <= WH_RESIDENT_BYTES_CAP
    if wh_resident:
        wh_spec = pl.BlockSpec(memory_space=pltpu.MemorySpace.VMEM)
    else:
        wh_spec = pl.BlockSpec((tk, f_pad), lambda i, j: (j, 0))

    # Honest VMEM estimate: double-buffered pipelined tiles, scratch, the
    # resident Wh copy, and the (tq, tk) f32 slab temporaries the compiler
    # materialises for e / p (matters on v7x's 64 MiB VMEM).
    est = 0
    est += 2 * _pad_up(tq, 32) * _pad_up(tk, LANES)        # adj int8 tiles
    est += 2 * _pad_up(tq, 8) * LANES * 4                  # f1 tiles (lane-padded)
    est += 2 * 8 * _pad_up(tk, LANES) * 4                  # f2 tiles
    est += 2 * _pad_up(tq, 8) * f_pad * 4                  # out tiles
    est += 2 * _pad_up(tq, 8) * LANES * 4                  # m, l scratch
    est += _pad_up(tq, 8) * f_pad * 4                      # acc scratch
    if wh_resident:
        est += NP * f_pad * 2                              # resident Wh (bf16)
    else:
        est += 2 * _pad_up(tk, 16) * f_pad * 2             # streamed Wh tiles
    est += 5 * tq * tk * 4                                 # e/p slab temporaries
    vmem_limit = min(max(est + (8 << 20), 32 << 20), 48 << 20)

    wh_stream_factor = 1 if wh_resident else NP // tq
    cost = pl.CostEstimate(
        flops=2 * NP * NP * f_pad + 7 * NP * NP + 2 * NP * f_in * f_pad,
        transcendentals=NP * NP,
        bytes_accessed=(NP * NP                            # adjacency (int8)
                        + wh_stream_factor * NP * f_pad * 2
                        + NP * f_pad * 4                   # output
                        + (NP // tq) * NP * 4 + NP * 4))   # f2 re-stream + f1

    out_pad = pl.pallas_call(
        functools.partial(attn_kernel, slope=leakyrelu_slope, tk=tk,
                          wh_resident=wh_resident),
        out_shape=jax.ShapeDtypeStruct((NP, f_pad), jnp.float32),
        grid_spec=pltpu.PrefetchScalarGridSpec(
            num_scalar_prefetch=0,
            grid=(NP // tq, NP // tk),
            in_specs=[pl.BlockSpec((tq, 1), lambda i, j: (i, 0)),
                      pl.BlockSpec((1, tk), lambda i, j: (0, j)),
                      pl.BlockSpec((tq, tk), lambda i, j: (i, j)),
                      wh_spec],
            out_specs=pl.BlockSpec((tq, f_pad), lambda i, j: (i, 0)),
            scratch_shapes=[pltpu.VMEM((tq, 1), jnp.float32),
                            pltpu.VMEM((tq, 1), jnp.float32),
                            pltpu.VMEM((tq, f_pad), jnp.float32)]),
        compiler_params=pltpu.CompilerParams(
            dimension_semantics=("parallel", "arbitrary"),
            vmem_limit_bytes=vmem_limit),
        cost_estimate=cost,
    )(f1, f2, adj_i8, wh)

    # Drop the node and lane padding back to the real output shape.
    return out_pad[:N, :f_out]


# ---------------------------------------------------------------------------
# Reference + test harness
# ---------------------------------------------------------------------------
def xavier_uniform(key, shape, gain):
    fan_in, fan_out = shape
    bound = gain * (6.0 / (fan_in + fan_out)) ** 0.5
    return jax.random.uniform(key, shape, jnp.float32, -bound, bound)


def sgat_reference(h, adj, W, a, slope=0.01):
    # Pure-JAX mirror of the PyTorch forward.
    wh = h @ W
    N, f_out = wh.shape
    wh_i = jnp.repeat(wh, N, axis=0)
    wh_j = jnp.tile(wh, (N, 1))
    a_input = jnp.concatenate([wh_i, wh_j], axis=1).reshape(N, N, 2 * f_out)
    e = jnp.squeeze(a_input @ a, 2)
    e = jnp.where(e > 0, e, slope * e)
    att = jnp.where(adj > 0, e, NEG_BIG)
    att = jax.nn.softmax(att, axis=1)
    return att @ wh


if __name__ == "__main__":
    N, input_size, output_size = 8, 32, 16
    slope = 0.01

    key = jax.random.PRNGKey(0)
    k_w, k_a, k_h, k_adj = jax.random.split(key, 4)

    # Deterministic params matching nn.init.xavier_uniform_(gain=1.414)
    W = xavier_uniform(k_w, (input_size, output_size), gain=1.414)
    a = xavier_uniform(k_a, (2 * output_size, 1), gain=1.414)

    h = jax.random.normal(k_h, (N, input_size), jnp.float32)
    adj = (jax.random.uniform(k_adj, (N, N)) > 0.5).astype(jnp.float32)
    adj = jnp.maximum(adj, jnp.eye(N, dtype=jnp.float32))  # self-loops

    out = jax.block_until_ready(sgat_forward(h, adj, W, a, slope))

    ref = sgat_reference(h, adj, W, a, slope)
    assert out.shape == (N, output_size)
    # bf16 aggregation (f32 accumulation) -> slightly relaxed tolerance.
    assert jnp.allclose(out, ref, atol=2e-2, rtol=2e-2), (
        "mismatch vs reference: max abs err "
        f"{float(jnp.max(jnp.abs(out - ref)))}")

    print("KERNEL_OK")
</pallas_src>

<mosaic_0001>
module attributes {stable_mosaic.version = 11 : i64} {
  func.func @proj_kernel(%arg0: i32, %arg1: memref<128x32xf32, #tpu.memory_space<vmem>>, %arg2: memref<32x128xf32, #tpu.memory_space<vmem>>, %arg3: memref<2x128xf32, #tpu.memory_space<vmem>>, %arg4: memref<128x128xbf16, #tpu.memory_space<vmem>>, %arg5: memref<128x128xf32, #tpu.memory_space<vmem>>) attributes {dimension_semantics = [#tpu.dimension_semantics<parallel>], iteration_bounds = array<i64: 1>, scalar_prefetch = 0 : i64, scratch_operands = 0 : i64, tpu.core_type = #tpu.core_type<tc>, window_params = [{transform_indices = @transform_0, window_bounds = array<i64: 128, 32>}, {pipeline_mode = #tpu.pipeline_mode<synchronous>, transform_indices = @transform_1, window_bounds = array<i64: 32, 128>}, {pipeline_mode = #tpu.pipeline_mode<synchronous>, transform_indices = @transform_2, window_bounds = array<i64: 2, 128>}, {transform_indices = @transform_3, window_bounds = array<i64: 128, 128>}, {transform_indices = @transform_4, window_bounds = array<i64: 128, 128>}]} {
    %c0 = arith.constant 0 : index
    %c0_0 = arith.constant 0 : index
    %0 = vector.load %arg1[%c0, %c0_0] : memref<128x32xf32, #tpu.memory_space<vmem>>, vector<128x32xf32>
    %c0_1 = arith.constant 0 : index
    %c0_2 = arith.constant 0 : index
    %1 = vector.load %arg2[%c0_1, %c0_2] : memref<32x128xf32, #tpu.memory_space<vmem>>, vector<32x128xf32>
    %cst = arith.constant dense<0.000000e+00> : vector<128x128xf32>
    %2 = tpu.matmul %0, %1, %cst {dimension_numbers = #tpu.dot_dimension_numbers<[1], [0], [0], [1], [0, 0, 1, 1], [], []>} : vector<128x32xf32>, vector<32x128xf32>, vector<128x128xf32> -> vector<128x128xf32>
    %c0_3 = arith.constant 0 : index
    %c0_4 = arith.constant 0 : index
    %3 = vector.load %arg3[%c0_3, %c0_4] : memref<2x128xf32, #tpu.memory_space<vmem>>, vector<1x128xf32>
    %4 = vector.broadcast %3 : vector<1x128xf32> to vector<128x128xf32>
    %5 = arith.mulf %2, %4 : vector<128x128xf32>
    %cst_5 = arith.constant dense<0.000000e+00> : vector<128xf32>
    %6 = vector.multi_reduction <add>, %5, %cst_5 [1] : vector<128x128xf32> to vector<128xf32>
    %7 = vector.shape_cast %6 : vector<128xf32> to vector<128x1xf32>
    %c1 = arith.constant 1 : index
    %c0_6 = arith.constant 0 : index
    %8 = vector.load %arg3[%c1, %c0_6] : memref<2x128xf32, #tpu.memory_space<vmem>>, vector<1x128xf32>
    %9 = vector.broadcast %8 : vector<1x128xf32> to vector<128x128xf32>
    %10 = arith.mulf %2, %9 : vector<128x128xf32>
    %cst_7 = arith.constant dense<0.000000e+00> : vector<128xf32>
    %11 = vector.multi_reduction <add>, %10, %cst_7 [1] : vector<128x128xf32> to vector<128xf32>
    %12 = vector.shape_cast %11 : vector<128xf32> to vector<128x1xf32>
    %cst_8 = arith.constant 0.000000e+00 : f32
    %13 = vector.broadcast %cst_8 : f32 to vector<128x126xf32>
    %14 = tpu.concatenate %7, %12, %13 in 1 : vector<128x1xf32>, vector<128x1xf32>, vector<128x126xf32> -> vector<128x128xf32>
    %c0_9 = arith.constant 0 : index
    %c0_10 = arith.constant 0 : index
    %15 = vector.load %arg5[%c0_9, %c0_10] : memref<128x128xf32, #tpu.memory_space<vmem>>, vector<128x128xf32>
    tpu.vector_store %arg5[%c0_9, %c0_10], %14 {strides = array<i32>} : memref<128x128xf32, #tpu.memory_space<vmem>>, vector<128x128xf32>,
    %16 = arith.truncf %2 : vector<128x128xf32> to vector<128x128xbf16>
    %c0_11 = arith.constant 0 : index
    %c0_12 = arith.constant 0 : index
    %17 = vector.load %arg4[%c0_11, %c0_12] : memref<128x128xbf16, #tpu.memory_space<vmem>>, vector<128x128xbf16>
    tpu.vector_store %arg4[%c0_11, %c0_12], %16 {strides = array<i32>} : memref<128x128xbf16, #tpu.memory_space<vmem>>, vector<128x128xbf16>,
    return
  }
  func.func @transform_0(%arg0: i32) -> (i32, i32) {
    %c0_i32 = arith.constant 0 : i32
    %c0_i32_0 = arith.constant 0 : i32
    return %arg0, %c0_i32 : i32, i32
  }
  func.func @transform_1(%arg0: i32) -> (i32, i32) {
    %c0_i32 = arith.constant 0 : i32
    %c0_i32_0 = arith.constant 0 : i32
    %c0_i32_1 = arith.constant 0 : i32
    return %c0_i32, %c0_i32_0 : i32, i32
  }
  func.func @transform_2(%arg0: i32) -> (i32, i32) {
    %c0_i32 = arith.constant 0 : i32
    %c0_i32_0 = arith.constant 0 : i32
    %c0_i32_1 = arith.constant 0 : i32
    return %c0_i32, %c0_i32_0 : i32, i32
  }
  func.func @transform_3(%arg0: i32) -> (i32, i32) {
    %c0_i32 = arith.constant 0 : i32
    %c0_i32_0 = arith.constant 0 : i32
    return %arg0, %c0_i32 : i32, i32
  }
  func.func @transform_4(%arg0: i32) -> (i32, i32) {
    %c0_i32 = arith.constant 0 : i32
    %c0_i32_0 = arith.constant 0 : i32
    return %arg0, %c0_i32 : i32, i32
  }
}

</mosaic_0001>

<bundles_post_ra>
// kernel: tpu_custom_call.1
= control target key start
LH: loop header
LB: loop body
LE: loop exit
PB: predicated region body
PF: predicated region fallthrough
CT: control target
= control target key end

     0   :  { %10 = vsyncpa [#allocation3], 0  ;;  %vm38_vm0 = vcmask 261120   ;;  %s894_s0 = inlined_call_operand.vmem [shape: f32[128,32], index: 0, kind: input, shape index: {}]   ;;  %s895_s1 = inlined_call_operand.vmem [shape: f32[32,128], index: 1, kind: input, shape index: {}]   ;;  %s896_s2 = inlined_call_operand.vmem [shape: f32[2,128], index: 2, kind: input, shape index: {}]   ;;  %s897_s3 = inlined_call_operand.hbm [shape: bf16[128,128], index: 3, kind: output, shape index: {0}]   ;;  %s898_s4 = inlined_call_operand.hbm [shape: f32[128,128], index: 4, kind: output, shape index: {1}]  }
   0x1   :  { %v37_v0 = vld [vmem:[%s895_s1 + $0x18] sm:$0xff]  ;;  %v36_v1 = vld [vmem:[%s895_s1 + $0x10] sm:$0xff]  ;;  %v35_v2 = vld [vmem:[%s895_s1 + $0x8] sm:$0xff] }
   0x2   :  { %617 = vmatprep.subr.mxu0 %v37_v0  ;;  %649 = vmatprep.subr.mxu1 %v37_v0  ;;  %v34_v3 = vld [vmem:[%s895_s1] sm:$0xff] }
   0x3   :  { %618 = vmatpush3.msra.mxu0 %v37_v0  ;;  %653 = vmatpush3.msra.mxu1 %v37_v0  ;;  %v18_v4 = vld [vmem:[%s894_s0] sm:$0xff] }
   0x4   :  { %619 = vmatprep.subr.mxu0 %v36_v1  ;;  %650 = vmatprep.subr.mxu1 %v36_v1  ;;  %v26_v5 = vld [vmem:[%s894_s0 + $0x40] sm:$0xff] }
   0x5   :  { %620 = vmatpush3.msra.mxu0 %v36_v1  ;;  %654 = vmatpush3.msra.mxu1 %v36_v1 }
   0x6   :  { %621 = vmatprep.subr.mxu0 %v35_v2  ;;  %651 = vmatprep.subr.mxu1 %v35_v2 }
   0x7   :  { %622 = vmatpush3.msra.mxu0 %v35_v2  ;;  %655 = vmatpush3.msra.mxu1 %v35_v2 }
   0x8   :  { %11 = vsyncpa [#allocation5], 0  ;;  %623 = vmatprep.subr.mxu0 %v34_v3  ;;  %652 = vmatprep.subr.mxu1 %v34_v3  ;;  %v19_v6 = vld [vmem:[%s894_s0 + $0x8] sm:$0xff]  ;;  %v20_v8 = vld [vmem:[%s894_s0 + $0x10] sm:$0xff] }
   0x9   :  { %v27_v7 = vld [vmem:[%s894_s0 + $0x48] sm:$0xff]  ;;  %624 = vmatpush3.msra.mxu0 %v34_v3  ;;  %656 = vmatpush3.msra.mxu1 %v34_v3  ;;  %v28_v9 = vld [vmem:[%s894_s0 + $0x50] sm:$0xff]  ;;  %v21_v10 = vld [vmem:[%s894_s0 + $0x18] sm:$0xff] }
   0xa   :  { %625 = vmatprep.mubr.msk.f32.mxu0 %vm38_vm0, %v18_v4  ;;  %637 = vmatprep.mubr.msk.f32.mxu1 %vm38_vm0, %v26_v5  ;;  %v29_v11 = vld [vmem:[%s894_s0 + $0x58] sm:$0xff]  ;;  %v22_v12 = vld [vmem:[%s894_s0 + $0x20] sm:$0xff]  ;;  %v23_v14 = vld [vmem:[%s894_s0 + $0x28] sm:$0xff] }
   0xb   :  { %626 = vmatmul.mubr.msk.f32.vlgmr.msra.gmra.mxu0 %vm38_vm0, %v19_v6  ;;  %638 = vmatmul.mubr.msk.f32.vlgmr.msra.gmra.mxu1 %vm38_vm0, %v27_v7  ;;  %v30_v13 = vld [vmem:[%s894_s0 + $0x60] sm:$0xff]  ;;  %v31_v15 = vld [vmem:[%s894_s0 + $0x68] sm:$0xff]  ;;  %v24_v16 = vld [vmem:[%s894_s0 + $0x30] sm:$0xff] }
   0xc   :  { %628 = vmatprep.mubr.msk.f32.mxu0 %vm38_vm0, %v20_v8  ;;  %640 = vmatprep.mubr.msk.f32.mxu1 %vm38_vm0, %v28_v9  ;;  %v32_v17 = vld [vmem:[%s894_s0 + $0x70] sm:$0xff]  ;;  %v25_v18 = vld [vmem:[%s894_s0 + $0x38] sm:$0xff]  ;;  %v817_v20 = vld [vmem:[%s896_s2] ss:$0 sm:$0xff] }
   0xd   :  { %v33_v19 = vld [vmem:[%s894_s0 + $0x78] sm:$0xff]  ;;  %v824_v27 = vld [vmem:[%s896_s2 + $0x1] ss:$0 sm:$0xff]  ;;  %s707_s0 = smov [#allocation2]  }
   0xe   :  { %s473_s2 = sshll.u32 %s707_s0, 4  ;;  %s474_s2 = int_to_ptr.vmem [resolvable:$true] %s473_s2 }
   0xf   :  { %629 = vmatmul.mubr.msk.f32.gmra.mxu0 %vm38_vm0, %v21_v10  ;;  %641 = vmatmul.mubr.msk.f32.gmra.mxu1 %vm38_vm0, %v29_v11  ;;  %s663_s5 = scalar_lea.vmem %s474_s2, 1024  ;;  %p668_p1 = scmp.lt.s32.totalorder %s474_s2, %s474_s2 }
  0x10   :  { %631 = vmatprep.mubr.msk.f32.mxu0 %vm38_vm0, %v22_v12  ;;  %643 = vmatprep.mubr.msk.f32.mxu1 %vm38_vm0, %v30_v13  ;;  %p664_p0 = scmp.ne.s32.totalorder %s474_s2, %s663_s5  ;;  %p669_p2 = scmp.lt.s32.totalorder %s663_s5, %s663_s5 }
  0x12   :  { %p670_p3 = por %p669_p2, %p668_p1 }
  0x13   :  { %632 = vmatmul.mubr.msk.f32.gmra.mxu0 %vm38_vm0, %v23_v14  ;;  %644 = vmatmul.mubr.msk.f32.gmra.mxu1 %vm38_vm0, %v31_v15 }
  0x14   :  { %634 = vmatprep.mubr.msk.f32.mxu0 %vm38_vm0, %v24_v16  ;;  %646 = vmatprep.mubr.msk.f32.mxu1 %vm38_vm0, %v32_v17  ;;  %p671_p4 = pnand %p670_p3, %p664_p0 }
  0x17   :  { %635 = vmatmul.mubr.msk.f32.gmra.mxu0 %vm38_vm0, %v25_v18  ;;  %647 = vmatmul.mubr.msk.f32.gmra.mxu1 %vm38_vm0, %v33_v19 }
  0xcb   :  { %v627_v21 = vpop.f32.mrf.mxu0  ;;  %v639_v22 = vpop.f32.mrf.mxu1 }
  0xcc   :  { %v246_v23 = vmul.f32 %v639_v22, %v817_v20  ;;  %v238_v24 = vmul.f32 %v627_v21, %v817_v20  ;;  %v291_v32 = vmul.f32 %v627_v21, %v824_v27  ;;  %v299_v40 = vmul.f32 %v639_v22, %v824_v27 }
  0xcd   :  { %v153_v25 = vpop.f32.mrf.mxu0  ;;  %v193_v26 = vpop.f32.mrf.mxu1 }
  0xce   :  { %v553_v28 = vpack.c.bf16 %v627_v21, %v153_v25  ;;  %v573_v29 = vpack.c.bf16 %v639_v22, %v193_v26  ;;  %271 = vadd.xlane.f32.xlu1 %v246_v23  ;;  %255 = vadd.xlane.f32.xlu0 %v238_v24  ;;  %v237_v33 = vmul.f32 %v817_v20, %v153_v25 }
  0xcf   :  { %v630_v30 = vpop.f32.mrf.mxu0  ;;  %v642_v31 = vpop.f32.mrf.mxu1  ;;  %v245_v41 = vmul.f32 %v817_v20, %v193_v26  ;;  %v290_v49 = vmul.f32 %v824_v27, %v153_v25  ;;  %v298_v55 = vmul.f32 %v824_v27, %v193_v26 }
  0xd0   :  { %554 = vst [vmem:[#allocation2] sm:$0xff] %v553_v28   ;;  %593 = vst [vmem:[#allocation2 + $0x20] sm:$0xff] %v573_v29   ;;  %v240_v44 = vmul.f32 %v630_v30, %v817_v20  ;;  %v248_v52 = vmul.f32 %v642_v31, %v817_v20  ;;  %v293_v57 = vmul.f32 %v630_v30, %v824_v27 }
  0xd1   :  { %v163_v34 = vpop.f32.mrf.mxu0  ;;  %v203_v35 = vpop.f32.mrf.mxu1  ;;  %v301_v58 = vmul.f32 %v642_v31, %v824_v27 }
  0xd2   :  { %308 = vadd.xlane.f32.xlu1 %v291_v32  ;;  %253 = vadd.xlane.f32.xlu0 %v237_v33  ;;  %v558_v36 = vpack.c.bf16 %v630_v30, %v163_v34  ;;  %v578_v37 = vpack.c.bf16 %v642_v31, %v203_v35  ;;  %v247_v56 = vmul.f32 %v817_v20, %v203_v35 }
  0xd3   :  { %v633_v38 = vpop.f32.mrf.mxu0  ;;  %v645_v39 = vpop.f32.mrf.mxu1  ;;  %v292_v59 = vmul.f32 %v824_v27, %v163_v34  ;;  %v300_v60 = vmul.f32 %v824_v27, %v203_v35  ;;  %v239_v61 = vmul.f32 %v817_v20, %v163_v34 }
  0xd4   :  { %590 = vst [vmem:[#allocation2 + $0x8] sm:$0xff] %v558_v36   ;;  %594 = vst [vmem:[#allocation2 + $0x28] sm:$0xff] %v578_v37   ;;  %v242_v62 = vmul.f32 %v633_v38, %v817_v20  ;;  %v250_v0 = vmul.f32 %v645_v39, %v817_v20  ;;  %v295_v2 = vmul.f32 %v633_v38, %v824_v27 }
  0xd5   :  { %v173_v42 = vpop.f32.mrf.mxu0  ;;  %v213_v43 = vpop.f32.mrf.mxu1  ;;  %v303_v4 = vmul.f32 %v645_v39, %v824_v27 }
  0xd6   :  { %324 = vadd.xlane.f32.xlu1 %v299_v40  ;;  %269 = vadd.xlane.f32.xlu0 %v245_v41  ;;  %v563_v45 = vpack.c.bf16 %v633_v38, %v173_v42  ;;  %v583_v46 = vpack.c.bf16 %v645_v39, %v213_v43  ;;  %v241_v63 = vmul.f32 %v817_v20, %v173_v42 }
  0xd7   :  { %v636_v47 = vpop.f32.mrf.mxu0  ;;  %v648_v48 = vpop.f32.mrf.mxu1  ;;  %v249_v1 = vmul.f32 %v817_v20, %v213_v43  ;;  %v294_v3 = vmul.f32 %v824_v27, %v173_v42  ;;  %v302_v5 = vmul.f32 %v824_v27, %v213_v43 }
  0xd8   :  { %591 = vst [vmem:[#allocation2 + $0x10] sm:$0xff] %v563_v45   ;;  %595 = vst [vmem:[#allocation2 + $0x30] sm:$0xff] %v583_v46   ;;  %v244_v6 = vmul.f32 %v636_v47, %v817_v20  ;;  %v252_v8 = vmul.f32 %v648_v48, %v817_v20  ;;  %v297_v10 = vmul.f32 %v636_v47, %v824_v27 }
  0xd9   :  { %v183_v50 = vpop.f32.mrf.mxu0  ;;  %v223_v51 = vpop.f32.mrf.mxu1  ;;  %v305_v12 = vmul.f32 %v648_v48, %v824_v27 }
  0xda   :  { %306 = vadd.xlane.f32.xlu0 %v290_v49  ;;  %259 = vadd.xlane.f32.xlu1 %v240_v44  ;;  %v568_v53 = vpack.c.bf16 %v636_v47, %v183_v50  ;;  %v588_v54 = vpack.c.bf16 %v648_v48, %v223_v51  ;;  %v243_v7 = vmul.f32 %v817_v20, %v183_v50 }
  0xdb   :  { %v251_v9 = vmul.f32 %v817_v20, %v223_v51  ;;  %v296_v11 = vmul.f32 %v824_v27, %v183_v50  ;;  %v304_v13 = vmul.f32 %v824_v27, %v223_v51 }
  0xdc   :  { %592 = vst [vmem:[#allocation2 + $0x18] sm:$0xff] %v568_v53   ;;  %596 = vst [vmem:[#allocation2 + $0x38] sm:$0xff] %v588_v54  }
  0xde   :  { %322 = vadd.xlane.f32.xlu0 %v298_v55  ;;  %275 = vadd.xlane.f32.xlu1 %v248_v52 }
  0xe2   :  { %273 = vadd.xlane.f32.xlu0 %v247_v56  ;;  %312 = vadd.xlane.f32.xlu1 %v293_v57 }
  0xe6   :  { %328 = vadd.xlane.f32.xlu1 %v301_v58  ;;  %310 = vadd.xlane.f32.xlu0 %v292_v59 }
  0xea   :  { %326 = vadd.xlane.f32.xlu0 %v300_v60  ;;  %257 = vadd.xlane.f32.xlu1 %v239_v61 }
  0xee   :  { %263 = vadd.xlane.f32.xlu1 %v242_v62  ;;  %261 = vadd.xlane.f32.xlu0 %v241_v63 }
  0xf2   :  { %279 = vadd.xlane.f32.xlu1 %v250_v0  ;;  %277 = vadd.xlane.f32.xlu0 %v249_v1 }
  0xf6   :  { %316 = vadd.xlane.f32.xlu1 %v295_v2  ;;  %314 = vadd.xlane.f32.xlu0 %v294_v3 }
  0xfa   :  { %332 = vadd.xlane.f32.xlu1 %v303_v4  ;;  %330 = vadd.xlane.f32.xlu0 %v302_v5 }
  0xfe   :  { %267 = vadd.xlane.f32.xlu1 %v244_v6  ;;  %265 = vadd.xlane.f32.xlu0 %v243_v7 }
 0x102   :  { %283 = vadd.xlane.f32.xlu1 %v252_v8  ;;  %281 = vadd.xlane.f32.xlu0 %v251_v9 }
 0x106   :  { %320 = vadd.xlane.f32.xlu1 %v297_v10  ;;  %318 = vadd.xlane.f32.xlu0 %v296_v11 }
 0x10a   :  { %336 = vadd.xlane.f32.xlu1 %v305_v12  ;;  %334 = vadd.xlane.f32.xlu0 %v304_v13 }
 0x10b   :  { %674 = shalt.err (!%p671_p4)
}
 0x10c   :  { %s708_s6 = smov 64   ;;  %s709_s7 = smov 4   ;;  %vm338_vm1 = vcmask 7168   ;;  %vm355_vm2 = vcmask 15360  }
 0x10d   :  { %479 = dma.vmem_to_hbm [thread:$0]  %s474_s2, 1024, %s897_s3, [#allocation3], %s708_s6, %s708_s6, %s709_s7  }
 0x10e   :  { %s710_s3 = smov [#allocation4]  }
 0x10f   :  { %s485_s10 = sshll.u32 %s710_s3, 4  ;;  %s486_s10 = int_to_ptr.vmem [resolvable:$true] %s485_s10 }
 0x110   :  { %s683_s11 = scalar_lea.vmem %s486_s10, 2048  ;;  %p688_p6 = scmp.lt.s32.totalorder %s486_s10, %s486_s10 }
 0x111   :  { %p684_p5 = scmp.ne.s32.totalorder %s486_s10, %s683_s11  ;;  %p689_p7 = scmp.lt.s32.totalorder %s683_s11, %s683_s11 }
 0x113   :  { %p690_p8 = por %p689_p7, %p688_p6 }
 0x115   :  { %p691_p9 = pnand %p690_p8, %p684_p5 }
 0x157   :  { %v272_v14 = vpop.xlane.xlu1 %271  ;;  %v256_v15 = vpop.xlane.xlu0 %255 }
 0x15b   :  { %v309_v16 = vpop.xlane.xlu1 %308  ;;  %v254_v17 = vpop.xlane.xlu0 %253 }
 0x15c   :  { %v340_v18 = vsel %vm338_vm1, %v256_v15, %v309_v16 }
 0x15d   :  { %v357_v19 = vsel %vm355_vm2, %v340_v18, 0.0 }
 0x15e   :  { %373 = vst [vmem:[#allocation4 + $0x8] sm:$0xff] %v357_v19 }
 0x15f   :  { %v325_v20 = vpop.xlane.xlu1 %324  ;;  %v270_v21 = vpop.xlane.xlu0 %269 }
 0x160   :  { %v348_v22 = vsel %vm338_vm1, %v272_v14, %v325_v20 }
 0x161   :  { %v365_v23 = vsel %vm355_vm2, %v348_v22, 0.0 }
 0x162   :  { %381 = vst [vmem:[#allocation4 + $0x48] sm:$0xff] %v365_v23 }
 0x163   :  { %v307_v24 = vpop.xlane.xlu0 %306  ;;  %v260_v25 = vpop.xlane.xlu1 %259 }
 0x164   :  { %v339_v26 = vsel %vm338_vm1, %v254_v17, %v307_v24 }
 0x165   :  { %v356_v27 = vsel %vm355_vm2, %v339_v26, 0.0 }
 0x166   :  { %372 = vst [vmem:[#allocation4] sm:$0xff] %v356_v27 }
 0x167   :  { %v323_v28 = vpop.xlane.xlu0 %322  ;;  %v276_v29 = vpop.xlane.xlu1 %275 }
 0x168   :  { %v347_v30 = vsel %vm338_vm1, %v270_v21, %v323_v28 }
 0x169   :  { %v364_v31 = vsel %vm355_vm2, %v347_v30, 0.0 }
 0x16a   :  { %380 = vst [vmem:[#allocation4 + $0x40] sm:$0xff] %v364_v31 }
 0x16b   :  { %v274_v32 = vpop.xlane.xlu0 %273  ;;  %v313_v33 = vpop.xlane.xlu1 %312 }
 0x16c   :  { %v342_v34 = vsel %vm338_vm1, %v260_v25, %v313_v33 }
 0x16d   :  { %v359_v35 = vsel %vm355_vm2, %v342_v34, 0.0 }
 0x16e   :  { %375 = vst [vmem:[#allocation4 + $0x18] sm:$0xff] %v359_v35 }
 0x16f   :  { %v329_v36 = vpop.xlane.xlu1 %328  ;;  %v311_v37 = vpop.xlane.xlu0 %310 }
 0x170   :  { %v350_v38 = vsel %vm338_vm1, %v276_v29, %v329_v36 }
 0x171   :  { %v367_v39 = vsel %vm355_vm2, %v350_v38, 0.0 }
 0x172   :  { %383 = vst [vmem:[#allocation4 + $0x58] sm:$0xff] %v367_v39 }
 0x173   :  { %v327_v40 = vpop.xlane.xlu0 %326  ;;  %v258_v41 = vpop.xlane.xlu1 %257 }
 0x174   :  { %v349_v42 = vsel %vm338_vm1, %v274_v32, %v327_v40  ;;  %v341_v43 = vsel %vm338_vm1, %v258_v41, %v311_v37 }
 0x175   :  { %v366_v44 = vsel %vm355_vm2, %v349_v42, 0.0  ;;  %v358_v45 = vsel %vm355_vm2, %v341_v43, 0.0 }
 0x176   :  { %382 = vst [vmem:[#allocation4 + $0x50] sm:$0xff] %v366_v44  ;;  %374 = vst [vmem:[#allocation4 + $0x10] sm:$0xff] %v358_v45 }
 0x177   :  { %v264_v46 = vpop.xlane.xlu1 %263  ;;  %v262_v47 = vpop.xlane.xlu0 %261 }
 0x17b   :  { %v280_v48 = vpop.xlane.xlu1 %279  ;;  %v278_v49 = vpop.xlane.xlu0 %277 }
 0x17f   :  { %v317_v50 = vpop.xlane.xlu1 %316  ;;  %v315_v51 = vpop.xlane.xlu0 %314 }
 0x180   :  { %v344_v52 = vsel %vm338_vm1, %v264_v46, %v317_v50  ;;  %v343_v53 = vsel %vm338_vm1, %v262_v47, %v315_v51 }
 0x181   :  { %v361_v54 = vsel %vm355_vm2, %v344_v52, 0.0  ;;  %v360_v55 = vsel %vm355_vm2, %v343_v53, 0.0 }
 0x182   :  { %377 = vst [vmem:[#allocation4 + $0x28] sm:$0xff] %v361_v54  ;;  %376 = vst [vmem:[#allocation4 + $0x20] sm:$0xff] %v360_v55 }
 0x183   :  { %v333_v56 = vpop.xlane.xlu1 %332  ;;  %v331_v57 = vpop.xlane.xlu0 %330 }
 0x184   :  { %v352_v58 = vsel %vm338_vm1, %v280_v48, %v333_v56  ;;  %v351_v59 = vsel %vm338_vm1, %v278_v49, %v331_v57 }
 0x185   :  { %v369_v60 = vsel %vm355_vm2, %v352_v58, 0.0  ;;  %v368_v61 = vsel %vm355_vm2, %v351_v59, 0.0 }
 0x186   :  { %385 = vst [vmem:[#allocation4 + $0x68] sm:$0xff] %v369_v60  ;;  %384 = vst [vmem:[#allocation4 + $0x60] sm:$0xff] %v368_v61 }
 0x187   :  { %v268_v62 = vpop.xlane.xlu1 %267  ;;  %v266_v63 = vpop.xlane.xlu0 %265 }
 0x18b   :  { %v284_v0 = vpop.xlane.xlu1 %283  ;;  %v282_v1 = vpop.xlane.xlu0 %281 }
 0x18f   :  { %v321_v2 = vpop.xlane.xlu1 %320  ;;  %v319_v3 = vpop.xlane.xlu0 %318 }
 0x190   :  { %v346_v4 = vsel %vm338_vm1, %v268_v62, %v321_v2  ;;  %v345_v5 = vsel %vm338_vm1, %v266_v63, %v319_v3 }
 0x191   :  { %v363_v6 = vsel %vm355_vm2, %v346_v4, 0.0  ;;  %v362_v7 = vsel %vm355_vm2, %v345_v5, 0.0 }
 0x192   :  { %379 = vst [vmem:[#allocation4 + $0x38] sm:$0xff] %v363_v6  ;;  %378 = vst [vmem:[#allocation4 + $0x30] sm:$0xff] %v362_v7 }
 0x193   :  { %v337_v8 = vpop.xlane.xlu1 %336  ;;  %v335_v9 = vpop.xlane.xlu0 %334 }
 0x194   :  { %v354_v10 = vsel %vm338_vm1, %v284_v0, %v337_v8  ;;  %v353_v11 = vsel %vm338_vm1, %v282_v1, %v335_v9 }
 0x195   :  { %v371_v12 = vsel %vm355_vm2, %v354_v10, 0.0  ;;  %v370_v13 = vsel %vm355_vm2, %v353_v11, 0.0 }
 0x196   :  { %387 = vst [vmem:[#allocation4 + $0x78] sm:$0xff] %v371_v12  ;;  %386 = vst [vmem:[#allocation4 + $0x70] sm:$0xff] %v370_v13 }
 0x197   :  { %694 = shalt.err (!%p691_p9)
}
 0x198   :  { %s711_s12 = smov 128   ;;  %s712_s13 = smov 8  }
 0x199   :  { %491 = dma.vmem_to_hbm [thread:$0]  %s486_s10, 2048, %s898_s4, [#allocation5], %s711_s12, %s711_s12, %s712_s13  }
 0x19a   :  { %703 = dma.done.wait [#allocation3], 1024  }
 0x19b   :  { %704 = vsyncadd [#allocation3], 4294966272 }
 0x19c   :  { %705 = dma.done.wait [#allocation5], 2048  }
 0x19d   :  { %706 = vsyncadd [#allocation5], 4294965248 }
 0x19e   :  { %498 = vsyncpa [#allocation3], 1 }
 0x19f   :  { %499 = vsyncpa [#allocation5], 1 }

</bundles_post_ra>
